<compile_context>
chip_gen: v7x
topology: tpu7x:2x2x1
jax: 0.10.0
libtpu: 0.0.40
codegen_flags: <defaults>
</compile_context>

<pallas_src>
import jax
import jax.numpy as jnp
from jax import lax
from jax.experimental import pallas as pl
from jax.experimental.pallas import tpu as pltpu

_SUB = 8  # sublane tile / static unroll factor of the recurrence


def _round_up(n, m):
    return ((n + m - 1) // m) * m


def _selective_ssm_kernel(x_ref, at_ref, bt_ref, ct_ref, dt_ref, y_ref,
                          h_ref, ub_ref, xd_ref):
    # x_ref : (Bt, TL, d_model)   current (batch-tile, seq-chunk) block
    # at_ref: (d_state, d_state)  = A.T  (f32, resident: constant index_map)
    # bt_ref: (d_model, d_state)  = B.T  (f32 or bf16)
    # ct_ref: (d_state, d_model)  = C.T  (f32 or bf16)
    # dt_ref: (d_model, d_model)  = D.T  (f32 or bf16)
    # y_ref : (Bt, TL, d_model)   output block
    # h_ref : (Bt, d_state)  f32  persistent scratch: recurrent state across chunks
    # ub_ref: (Bt, TL, d_state) f32 scratch: hoisted x @ B.T
    # xd_ref: (Bt, TL, d_model) f32 scratch: hoisted x @ D.T
    nb, tl, d_model = x_ref.shape
    d_state = at_ref.shape[0]
    n_sub = tl // _SUB

    # Reset the recurrent state at the first seq-chunk of each batch tile.
    @pl.when(pl.program_id(1) == 0)
    def _():
        h_ref[...] = jnp.zeros_like(h_ref)

    at = at_ref[...]          # recurrence weights kept f32
    ct = ct_ref[...]

    # ---- hoisted whole-chunk input projections (two big MXU matmuls) --------
    xf = x_ref[...].reshape(nb * tl, d_model).astype(bt_ref.dtype)
    ub_ref[...] = jnp.dot(xf, bt_ref[...],
                          preferred_element_type=jnp.float32
                          ).reshape(nb, tl, d_state)
    xd_ref[...] = jnp.dot(xf, dt_ref[...],
                          preferred_element_type=jnp.float32
                          ).reshape(nb, tl, d_model)

    t_sel = lax.broadcasted_iota(jnp.int32, (1, _SUB, 1), 1)

    # ---- serialized recurrence: (Bt, d_state) matmul + tanh per step --------
    def sub_chunk(j, h):
        base = pl.multiple_of(j * _SUB, _SUB)
        ub_blk = ub_ref[:, pl.ds(base, _SUB), :]          # (Bt, 8, d_state)
        h_blk = jnp.zeros((nb, _SUB, d_state), jnp.float32)
        for s in range(_SUB):                             # static unroll
            h = jnp.tanh(jnp.dot(h, at, preferred_element_type=jnp.float32)
                         + ub_blk[:, s, :])               # (Bt, d_state)
            h_blk = jnp.where(t_sel == s, h[:, None, :], h_blk)
        # Fused output projection for this 8-step slab (review #3): one
        # (Bt*8, d_state) x (d_state, d_model) matmul + the precomputed x@D.T
        # rows, written straight to the output block.
        y_slab = jnp.dot(h_blk.reshape(nb * _SUB, d_state).astype(ct.dtype),
                         ct, preferred_element_type=jnp.float32
                         ).reshape(nb, _SUB, d_model)
        y_slab = y_slab + xd_ref[:, pl.ds(base, _SUB), :]
        y_ref[:, pl.ds(base, _SUB), :] = y_slab.astype(y_ref.dtype)
        return h

    h_ref[...] = lax.fori_loop(0, n_sub, sub_chunk, h_ref[...])


def selective_ssm_pallas(x, A, B, C, D, *, chunk_len=512, batch_tile=None,
                         matmul_dtype=None):
    """x: (bsz, seq, d_model) or (bsz, d_model). Returns (bsz, seq, d_model).

    matmul_dtype: optional dtype (e.g. jnp.bfloat16) for the hoisted x@B.T,
    x@D.T and h@C.T MXU matmuls; the recurrence stays f32.
    """
    if x.ndim == 2:
        x = x[:, None, :]
    bsz, seq_len, d_model = x.shape
    d_state = A.shape[0]

    # Seq chunk length: multiple of the 8-row sublane tile, capped by the sequence.
    TL = min(_round_up(chunk_len, _SUB), _round_up(seq_len, _SUB))
    L_pad = _round_up(seq_len, TL)

    # Batch tile: fold as many batch rows as possible into one recurrence chain;
    # once bsz > 8, keep >= 2 tiles (multiples of 8 rows) so v7x megacore can
    # split the parallel batch axis across both TensorCores.
    if batch_tile is None:
        if bsz <= _SUB:
            batch_tile = bsz
        else:
            batch_tile = min(64, _round_up((bsz + 1) // 2, _SUB))
    batch_tile = max(1, min(int(batch_tile), bsz))
    B_pad = _round_up(bsz, batch_tile)

    x_p = x
    if (L_pad != seq_len) or (B_pad != bsz):
        x_p = jnp.pad(x, ((0, B_pad - bsz), (0, L_pad - seq_len), (0, 0)))

    n_btiles = B_pad // batch_tile
    n_chunks = L_pad // TL

    w_dtype = x.dtype if matmul_dtype is None else matmul_dtype
    At_w = A.T.astype(jnp.float32)     # recurrence kept f32
    Bt_w = B.T.astype(w_dtype)
    Ct_w = C.T.astype(w_dtype)
    Dt_w = D.T.astype(w_dtype)

    # Scoped VMEM limit ~ 2x(x block) + 2x(y block) + weights + scratch (+headroom).
    x_itm = jnp.dtype(x.dtype).itemsize
    w_itm = jnp.dtype(w_dtype).itemsize
    blk_io = batch_tile * TL * d_model * x_itm
    w_bytes = (d_state * d_state * 4
               + (2 * d_model * d_state + d_model * d_model) * w_itm)
    scratch_b = 4 * batch_tile * (d_state + TL * d_state + TL * d_model)
    vmem_limit = int(min(max(4 * blk_io + 2 * w_bytes + scratch_b + (4 << 20),
                             32 << 20),
                         96 << 20))

    y = pl.pallas_call(
        _selective_ssm_kernel,
        out_shape=jax.ShapeDtypeStruct((B_pad, L_pad, d_model), x.dtype),
        grid=(n_btiles, n_chunks),
        in_specs=[
            pl.BlockSpec((batch_tile, TL, d_model), lambda b, i: (b, i, 0)),
            pl.BlockSpec((d_state, d_state), lambda b, i: (0, 0)),
            pl.BlockSpec((d_model, d_state), lambda b, i: (0, 0)),
            pl.BlockSpec((d_state, d_model), lambda b, i: (0, 0)),
            pl.BlockSpec((d_model, d_model), lambda b, i: (0, 0)),
        ],
        out_specs=pl.BlockSpec((batch_tile, TL, d_model), lambda b, i: (b, i, 0)),
        scratch_shapes=[
            pltpu.VMEM((batch_tile, d_state), jnp.float32),      # recurrent state
            pltpu.VMEM((batch_tile, TL, d_state), jnp.float32),  # hoisted x @ B.T
            pltpu.VMEM((batch_tile, TL, d_model), jnp.float32),  # hoisted x @ D.T
        ],
        compiler_params=pltpu.CompilerParams(
            dimension_semantics=("parallel", "arbitrary"),
            vmem_limit_bytes=vmem_limit),
    )(x_p, At_w, Bt_w, Ct_w, Dt_w)

    return y[:bsz, :seq_len, :]


def selective_ssm_ref(x, A, B, C, D):
    """Pure-JAX reference matching the PyTorch forward (eval mode), full-f32 matmuls."""
    if x.ndim == 2:
        x = x[:, None, :]
    bsz = x.shape[0]
    d_state = A.shape[0]
    hp = lax.Precision.HIGHEST

    def step(h, u):
        h_new = jnp.tanh(jnp.dot(h, A.T, precision=hp)
                         + jnp.dot(u, B.T, precision=hp))
        y = jnp.dot(h_new, C.T, precision=hp) + jnp.dot(u, D.T, precision=hp)
        return h_new, y

    h0 = jnp.zeros((bsz, d_state), jnp.float32)
    _, ys = lax.scan(step, h0, jnp.transpose(x, (1, 0, 2)))
    return jnp.transpose(ys, (1, 0, 2))


if __name__ == "__main__":
    d_model, d_state = 32, 16

    key = jax.random.PRNGKey(0)
    k_a, k_b, k_c, k_d, k1, k2, k3, k4 = jax.random.split(key, 8)

    # Deterministic parameter init (randn shapes as in the torch __init__).
    # A is scaled so the recurrence is contractive, keeping the f32
    # kernel-vs-reference comparison numerically well conditioned.
    A = 0.2 * jax.random.normal(k_a, (d_state, d_state), dtype=jnp.float32)
    B = jax.random.normal(k_b, (d_state, d_model), dtype=jnp.float32)
    C = jax.random.normal(k_c, (d_model, d_state), dtype=jnp.float32)
    D = jax.random.normal(k_d, (d_model, d_model), dtype=jnp.float32)

    # Case 1: single chunk, single batch tile.
    x1 = jax.random.normal(k1, (2, 8, d_model), dtype=jnp.float32)
    y1 = jax.block_until_ready(selective_ssm_pallas(x1, A, B, C, D))
    r1 = jax.block_until_ready(selective_ssm_ref(x1, A, B, C, D))
    assert y1.shape == (2, 8, d_model)
    assert jnp.allclose(y1, r1, atol=5e-3, rtol=5e-3), "case 1 mismatch"

    # Case 2: multiple seq chunks + tail padding + multi-slab state carry.
    x2 = jax.random.normal(k2, (3, 40, d_model), dtype=jnp.float32)
    y2 = jax.block_until_ready(selective_ssm_pallas(x2, A, B, C, D, chunk_len=16))
    r2 = jax.block_until_ready(selective_ssm_ref(x2, A, B, C, D))
    assert y2.shape == (3, 40, d_model)
    assert jnp.allclose(y2, r2, atol=5e-3, rtol=5e-3), "case 2 mismatch"

    # Case 3: batch tiling (2 tiles of 8 rows, batch padded 12->16) + seq chunks.
    x3 = jax.random.normal(k3, (12, 24, d_model), dtype=jnp.float32)
    y3 = jax.block_until_ready(selective_ssm_pallas(x3, A, B, C, D, chunk_len=16))
    r3 = jax.block_until_ready(selective_ssm_ref(x3, A, B, C, D))
    assert y3.shape == (12, 24, d_model)
    assert jnp.allclose(y3, r3, atol=5e-3, rtol=5e-3), "case 3 mismatch"

    # Case 3b: bf16 operands for the hoisted MXU projections (recurrence stays f32);
    # reduced-precision path validated with a mean-absolute-error bound.
    y3b = jax.block_until_ready(
        selective_ssm_pallas(x3, A, B, C, D, chunk_len=16,
                             matmul_dtype=jnp.bfloat16))
    assert y3b.shape == (12, 24, d_model)
    assert float(jnp.mean(jnp.abs(y3b - r3))) < 0.15, "case 3b (bf16) mismatch"

    # Case 4: 2-D input (module's x.dim()==2 branch -> seq_len == 1).
    x4 = jax.random.normal(k4, (4, d_model), dtype=jnp.float32)
    y4 = jax.block_until_ready(selective_ssm_pallas(x4, A, B, C, D))
    r4 = jax.block_until_ready(selective_ssm_ref(x4, A, B, C, D))
    assert y4.shape == (4, 1, d_model)
    assert jnp.allclose(y4, r4, atol=5e-3, rtol=5e-3), "case 4 mismatch"

    print("KERNEL_OK")
</pallas_src>

<mosaic_0001>
module attributes {stable_mosaic.version = 11 : i64} {
  func.func @_selective_ssm_kernel(%arg0: i32, %arg1: i32, %arg2: memref<2x8x32xf32, #tpu.memory_space<vmem>>, %arg3: memref<16x16xf32, #tpu.memory_space<vmem>>, %arg4: memref<32x16xf32, #tpu.memory_space<vmem>>, %arg5: memref<16x32xf32, #tpu.memory_space<vmem>>, %arg6: memref<32x32xf32, #tpu.memory_space<vmem>>, %arg7: memref<2x8x32xf32, #tpu.memory_space<vmem>>, %arg8: memref<2x16xf32, #tpu.memory_space<vmem>>, %arg9: memref<2x8x16xf32, #tpu.memory_space<vmem>>, %arg10: memref<2x8x32xf32, #tpu.memory_space<vmem>>) attributes {dimension_semantics = [#tpu.dimension_semantics<parallel>, #tpu.dimension_semantics<arbitrary>], iteration_bounds = array<i64: 1, 1>, scalar_prefetch = 0 : i64, scratch_operands = 3 : i64, tpu.core_type = #tpu.core_type<tc>, window_params = [{transform_indices = @transform_0, window_bounds = array<i64: 2, 8, 32>}, {pipeline_mode = #tpu.pipeline_mode<synchronous>, transform_indices = @transform_1, window_bounds = array<i64: 16, 16>}, {pipeline_mode = #tpu.pipeline_mode<synchronous>, transform_indices = @transform_2, window_bounds = array<i64: 32, 16>}, {pipeline_mode = #tpu.pipeline_mode<synchronous>, transform_indices = @transform_3, window_bounds = array<i64: 16, 32>}, {pipeline_mode = #tpu.pipeline_mode<synchronous>, transform_indices = @transform_4, window_bounds = array<i64: 32, 32>}, {transform_indices = @transform_5, window_bounds = array<i64: 2, 8, 32>}]} {
    %c0_i32 = arith.constant 0 : i32
    %0 = arith.cmpi eq, %arg1, %c0_i32 : i32
    %1 = arith.extui %0 : i1 to i32
    %c0_i32_0 = arith.constant 0 : i32
    %2 = arith.cmpi ne, %1, %c0_i32_0 : i32
    scf.if %2 {
      %cst_41 = arith.constant 0.000000e+00 : f32
      %135 = vector.broadcast %cst_41 : f32 to vector<2x16xf32>
      %c0_42 = arith.constant 0 : index
      %c0_43 = arith.constant 0 : index
      %136 = vector.load %arg8[%c0_42, %c0_43] : memref<2x16xf32, #tpu.memory_space<vmem>>, vector<2x16xf32>
      tpu.vector_store %arg8[%c0_42, %c0_43], %135 {strides = array<i32>} : memref<2x16xf32, #tpu.memory_space<vmem>>, vector<2x16xf32>,
    } else {
    }
    %c0 = arith.constant 0 : index
    %c0_1 = arith.constant 0 : index
    %3 = vector.load %arg3[%c0, %c0_1] : memref<16x16xf32, #tpu.memory_space<vmem>>, vector<16x16xf32>
    %c0_2 = arith.constant 0 : index
    %c0_3 = arith.constant 0 : index
    %4 = vector.load %arg5[%c0_2, %c0_3] : memref<16x32xf32, #tpu.memory_space<vmem>>, vector<16x32xf32>
    %c0_4 = arith.constant 0 : index
    %c0_5 = arith.constant 0 : index
    %c0_6 = arith.constant 0 : index
    %5 = vector.load %arg2[%c0_4, %c0_5, %c0_6] : memref<2x8x32xf32, #tpu.memory_space<vmem>>, vector<2x8x32xf32>
    %6 = vector.shape_cast %5 : vector<2x8x32xf32> to vector<16x32xf32>
    %c0_7 = arith.constant 0 : index
    %c0_8 = arith.constant 0 : index
    %7 = vector.load %arg4[%c0_7, %c0_8] : memref<32x16xf32, #tpu.memory_space<vmem>>, vector<32x16xf32>
    %cst = arith.constant dense<0.000000e+00> : vector<16x16xf32>
    %8 = tpu.matmul %6, %7, %cst {dimension_numbers = #tpu.dot_dimension_numbers<[1], [0], [0], [1], [0, 0, 1, 1], [], []>} : vector<16x32xf32>, vector<32x16xf32>, vector<16x16xf32> -> vector<16x16xf32>
    %9 = vector.shape_cast %8 : vector<16x16xf32> to vector<2x8x16xf32>
    %c0_9 = arith.constant 0 : index
    %c0_10 = arith.constant 0 : index
    %c0_11 = arith.constant 0 : index
    %10 = vector.load %arg9[%c0_9, %c0_10, %c0_11] : memref<2x8x16xf32, #tpu.memory_space<vmem>>, vector<2x8x16xf32>
    tpu.vector_store %arg9[%c0_9, %c0_10, %c0_11], %9 {strides = array<i32>} : memref<2x8x16xf32, #tpu.memory_space<vmem>>, vector<2x8x16xf32>,
    %c0_12 = arith.constant 0 : index
    %c0_13 = arith.constant 0 : index
    %11 = vector.load %arg6[%c0_12, %c0_13] : memref<32x32xf32, #tpu.memory_space<vmem>>, vector<32x32xf32>
    %cst_14 = arith.constant dense<0.000000e+00> : vector<16x32xf32>
    %12 = tpu.matmul %6, %11, %cst_14 {dimension_numbers = #tpu.dot_dimension_numbers<[1], [0], [0], [1], [0, 0, 1, 1], [], []>} : vector<16x32xf32>, vector<32x32xf32>, vector<16x32xf32> -> vector<16x32xf32>
    %13 = vector.shape_cast %12 : vector<16x32xf32> to vector<2x8x32xf32>
    %c0_15 = arith.constant 0 : index
    %c0_16 = arith.constant 0 : index
    %c0_17 = arith.constant 0 : index
    %14 = vector.load %arg10[%c0_15, %c0_16, %c0_17] : memref<2x8x32xf32, #tpu.memory_space<vmem>>, vector<2x8x32xf32>
    tpu.vector_store %arg10[%c0_15, %c0_16, %c0_17], %13 {strides = array<i32>} : memref<2x8x32xf32, #tpu.memory_space<vmem>>, vector<2x8x32xf32>,
    %15 = tpu.iota {dimensions = array<i32: 1>} : vector<1x8x1xi32>
    %c0_18 = arith.constant 0 : index
    %c0_19 = arith.constant 0 : index
    %16 = vector.load %arg8[%c0_18, %c0_19] : memref<2x16xf32, #tpu.memory_space<vmem>>, vector<2x16xf32>
    %c0_i32_20 = arith.constant 0 : i32
    %c8_i32 = arith.constant 8 : i32
    %17 = arith.muli %c0_i32_20, %c8_i32 : i32
    %18 = tpu.assume_multiple %17, 8 : i32
    %c0_21 = arith.constant 0 : index
    %19 = arith.index_cast %18 : i32 to index
    %c0_22 = arith.constant 0 : index
    %20 = vector.load %arg9[%c0_21, %19, %c0_22] : memref<2x8x16xf32, #tpu.memory_space<vmem>>, vector<2x8x16xf32>
    %cst_23 = arith.constant 0.000000e+00 : f32
    %21 = vector.broadcast %cst_23 : f32 to vector<2x8x16xf32>
    %cst_24 = arith.constant dense<0.000000e+00> : vector<2x16xf32>
    %22 = tpu.matmul %16, %3, %cst_24 {dimension_numbers = #tpu.dot_dimension_numbers<[1], [0], [0], [1], [0, 0, 1, 1], [], []>} : vector<2x16xf32>, vector<16x16xf32>, vector<2x16xf32> -> vector<2x16xf32>
    %23 = vector.extract_strided_slice %20 {offsets = [0, 0, 0], sizes = [2, 1, 16], strides = [1, 1, 1]} : vector<2x8x16xf32> to vector<2x1x16xf32>
    %24 = vector.shape_cast %23 : vector<2x1x16xf32> to vector<2x16xf32>
    %25 = arith.addf %22, %24 : vector<2x16xf32>
    %26 = math.tanh %25 : vector<2x16xf32>
    %c0_i32_25 = arith.constant 0 : i32
    %27 = vector.broadcast %c0_i32_25 : i32 to vector<1x8x1xi32>
    %28 = arith.cmpi eq, %15, %27 : vector<1x8x1xi32>
    %29 = vector.shape_cast %26 : vector<2x16xf32> to vector<2x1x16xf32>
    %30 = vector.shape_cast %28 : vector<1x8x1xi1> to vector<1x8x1xi1>
    %31 = vector.broadcast %30 : vector<1x8x1xi1> to vector<2x8x16xi1>
    %32 = vector.shape_cast %29 : vector<2x1x16xf32> to vector<2x1x16xf32>
    %33 = vector.broadcast %32 : vector<2x1x16xf32> to vector<2x8x16xf32>
    %34 = arith.select %31, %33, %21 : vector<2x8x16xi1>, vector<2x8x16xf32>
    %cst_26 = arith.constant dense<0.000000e+00> : vector<2x16xf32>
    %35 = tpu.matmul %26, %3, %cst_26 {dimension_numbers = #tpu.dot_dimension_numbers<[1], [0], [0], [1], [0, 0, 1, 1], [], []>} : vector<2x16xf32>, vector<16x16xf32>, vector<2x16xf32> -> vector<2x16xf32>
    %36 = vector.extract_strided_slice %20 {offsets = [0, 1, 0], sizes = [2, 1, 16], strides = [1, 1, 1]} : vector<2x8x16xf32> to vector<2x1x16xf32>
    %37 = vector.shape_cast %36 : vector<2x1x16xf32> to vector<2x16xf32>
    %38 = arith.addf %35, %37 : vector<2x16xf32>
    %39 = math.tanh %38 : vector<2x16xf32>
    %c1_i32 = arith.constant 1 : i32
    %40 = vector.broadcast %c1_i32 : i32 to vector<1x8x1xi32>
    %41 = arith.cmpi eq, %15, %40 : vector<1x8x1xi32>
    %42 = vector.shape_cast %39 : vector<2x16xf32> to vector<2x1x16xf32>
    %43 = vector.shape_cast %41 : vector<1x8x1xi1> to vector<1x8x1xi1>
    %44 = vector.broadcast %43 : vector<1x8x1xi1> to vector<2x8x16xi1>
    %45 = vector.shape_cast %42 : vector<2x1x16xf32> to vector<2x1x16xf32>
    %46 = vector.broadcast %45 : vector<2x1x16xf32> to vector<2x8x16xf32>
    %47 = arith.select %44, %46, %34 : vector<2x8x16xi1>, vector<2x8x16xf32>
    %cst_27 = arith.constant dense<0.000000e+00> : vector<2x16xf32>
    %48 = tpu.matmul %39, %3, %cst_27 {dimension_numbers = #tpu.dot_dimension_numbers<[1], [0], [0], [1], [0, 0, 1, 1], [], []>} : vector<2x16xf32>, vector<16x16xf32>, vector<2x16xf32> -> vector<2x16xf32>
    %49 = vector.extract_strided_slice %20 {offsets = [0, 2, 0], sizes = [2, 1, 16], strides = [1, 1, 1]} : vector<2x8x16xf32> to vector<2x1x16xf32>
    %50 = vector.shape_cast %49 : vector<2x1x16xf32> to vector<2x16xf32>
    %51 = arith.addf %48, %50 : vector<2x16xf32>
    %52 = math.tanh %51 : vector<2x16xf32>
    %c2_i32 = arith.constant 2 : i32
    %53 = vector.broadcast %c2_i32 : i32 to vector<1x8x1xi32>
    %54 = arith.cmpi eq, %15, %53 : vector<1x8x1xi32>
    %55 = vector.shape_cast %52 : vector<2x16xf32> to vector<2x1x16xf32>
    %56 = vector.shape_cast %54 : vector<1x8x1xi1> to vector<1x8x1xi1>
    %57 = vector.broadcast %56 : vector<1x8x1xi1> to vector<2x8x16xi1>
    %58 = vector.shape_cast %55 : vector<2x1x16xf32> to vector<2x1x16xf32>
    %59 = vector.broadcast %58 : vector<2x1x16xf32> to vector<2x8x16xf32>
    %60 = arith.select %57, %59, %47 : vector<2x8x16xi1>, vector<2x8x16xf32>
    %cst_28 = arith.constant dense<0.000000e+00> : vector<2x16xf32>
    %61 = tpu.matmul %52, %3, %cst_28 {dimension_numbers = #tpu.dot_dimension_numbers<[1], [0], [0], [1], [0, 0, 1, 1], [], []>} : vector<2x16xf32>, vector<16x16xf32>, vector<2x16xf32> -> vector<2x16xf32>
    %62 = vector.extract_strided_slice %20 {offsets = [0, 3, 0], sizes = [2, 1, 16], strides = [1, 1, 1]} : vector<2x8x16xf32> to vector<2x1x16xf32>
    %63 = vector.shape_cast %62 : vector<2x1x16xf32> to vector<2x16xf32>
    %64 = arith.addf %61, %63 : vector<2x16xf32>
    %65 = math.tanh %64 : vector<2x16xf32>
    %c3_i32 = arith.constant 3 : i32
    %66 = vector.broadcast %c3_i32 : i32 to vector<1x8x1xi32>
    %67 = arith.cmpi eq, %15, %66 : vector<1x8x1xi32>
    %68 = vector.shape_cast %65 : vector<2x16xf32> to vector<2x1x16xf32>
    %69 = vector.shape_cast %67 : vector<1x8x1xi1> to vector<1x8x1xi1>
    %70 = vector.broadcast %69 : vector<1x8x1xi1> to vector<2x8x16xi1>
    %71 = vector.shape_cast %68 : vector<2x1x16xf32> to vector<2x1x16xf32>
    %72 = vector.broadcast %71 : vector<2x1x16xf32> to vector<2x8x16xf32>
    %73 = arith.select %70, %72, %60 : vector<2x8x16xi1>, vector<2x8x16xf32>
    %cst_29 = arith.constant dense<0.000000e+00> : vector<2x16xf32>
    %74 = tpu.matmul %65, %3, %cst_29 {dimension_numbers = #tpu.dot_dimension_numbers<[1], [0], [0], [1], [0, 0, 1, 1], [], []>} : vector<2x16xf32>, vector<16x16xf32>, vector<2x16xf32> -> vector<2x16xf32>
    %75 = vector.extract_strided_slice %20 {offsets = [0, 4, 0], sizes = [2, 1, 16], strides = [1, 1, 1]} : vector<2x8x16xf32> to vector<2x1x16xf32>
    %76 = vector.shape_cast %75 : vector<2x1x16xf32> to vector<2x16xf32>
    %77 = arith.addf %74, %76 : vector<2x16xf32>
    %78 = math.tanh %77 : vector<2x16xf32>
    %c4_i32 = arith.constant 4 : i32
    %79 = vector.broadcast %c4_i32 : i32 to vector<1x8x1xi32>
    %80 = arith.cmpi eq, %15, %79 : vector<1x8x1xi32>
    %81 = vector.shape_cast %78 : vector<2x16xf32> to vector<2x1x16xf32>
    %82 = vector.shape_cast %80 : vector<1x8x1xi1> to vector<1x8x1xi1>
    %83 = vector.broadcast %82 : vector<1x8x1xi1> to vector<2x8x16xi1>
    %84 = vector.shape_cast %81 : vector<2x1x16xf32> to vector<2x1x16xf32>
    %85 = vector.broadcast %84 : vector<2x1x16xf32> to vector<2x8x16xf32>
    %86 = arith.select %83, %85, %73 : vector<2x8x16xi1>, vector<2x8x16xf32>
    %cst_30 = arith.constant dense<0.000000e+00> : vector<2x16xf32>
    %87 = tpu.matmul %78, %3, %cst_30 {dimension_numbers = #tpu.dot_dimension_numbers<[1], [0], [0], [1], [0, 0, 1, 1], [], []>} : vector<2x16xf32>, vector<16x16xf32>, vector<2x16xf32> -> vector<2x16xf32>
    %88 = vector.extract_strided_slice %20 {offsets = [0, 5, 0], sizes = [2, 1, 16], strides = [1, 1, 1]} : vector<2x8x16xf32> to vector<2x1x16xf32>
    %89 = vector.shape_cast %88 : vector<2x1x16xf32> to vector<2x16xf32>
    %90 = arith.addf %87, %89 : vector<2x16xf32>
    %91 = math.tanh %90 : vector<2x16xf32>
    %c5_i32 = arith.constant 5 : i32
    %92 = vector.broadcast %c5_i32 : i32 to vector<1x8x1xi32>
    %93 = arith.cmpi eq, %15, %92 : vector<1x8x1xi32>
    %94 = vector.shape_cast %91 : vector<2x16xf32> to vector<2x1x16xf32>
    %95 = vector.shape_cast %93 : vector<1x8x1xi1> to vector<1x8x1xi1>
    %96 = vector.broadcast %95 : vector<1x8x1xi1> to vector<2x8x16xi1>
    %97 = vector.shape_cast %94 : vector<2x1x16xf32> to vector<2x1x16xf32>
    %98 = vector.broadcast %97 : vector<2x1x16xf32> to vector<2x8x16xf32>
    %99 = arith.select %96, %98, %86 : vector<2x8x16xi1>, vector<2x8x16xf32>
    %cst_31 = arith.constant dense<0.000000e+00> : vector<2x16xf32>
    %100 = tpu.matmul %91, %3, %cst_31 {dimension_numbers = #tpu.dot_dimension_numbers<[1], [0], [0], [1], [0, 0, 1, 1], [], []>} : vector<2x16xf32>, vector<16x16xf32>, vector<2x16xf32> -> vector<2x16xf32>
    %101 = vector.extract_strided_slice %20 {offsets = [0, 6, 0], sizes = [2, 1, 16], strides = [1, 1, 1]} : vector<2x8x16xf32> to vector<2x1x16xf32>
    %102 = vector.shape_cast %101 : vector<2x1x16xf32> to vector<2x16xf32>
    %103 = arith.addf %100, %102 : vector<2x16xf32>
    %104 = math.tanh %103 : vector<2x16xf32>
    %c6_i32 = arith.constant 6 : i32
    %105 = vector.broadcast %c6_i32 : i32 to vector<1x8x1xi32>
    %106 = arith.cmpi eq, %15, %105 : vector<1x8x1xi32>
    %107 = vector.shape_cast %104 : vector<2x16xf32> to vector<2x1x16xf32>
    %108 = vector.shape_cast %106 : vector<1x8x1xi1> to vector<1x8x1xi1>
    %109 = vector.broadcast %108 : vector<1x8x1xi1> to vector<2x8x16xi1>
    %110 = vector.shape_cast %107 : vector<2x1x16xf32> to vector<2x1x16xf32>
    %111 = vector.broadcast %110 : vector<2x1x16xf32> to vector<2x8x16xf32>
    %112 = arith.select %109, %111, %99 : vector<2x8x16xi1>, vector<2x8x16xf32>
    %cst_32 = arith.constant dense<0.000000e+00> : vector<2x16xf32>
    %113 = tpu.matmul %104, %3, %cst_32 {dimension_numbers = #tpu.dot_dimension_numbers<[1], [0], [0], [1], [0, 0, 1, 1], [], []>} : vector<2x16xf32>, vector<16x16xf32>, vector<2x16xf32> -> vector<2x16xf32>
    %114 = vector.extract_strided_slice %20 {offsets = [0, 7, 0], sizes = [2, 1, 16], strides = [1, 1, 1]} : vector<2x8x16xf32> to vector<2x1x16xf32>
    %115 = vector.shape_cast %114 : vector<2x1x16xf32> to vector<2x16xf32>
    %116 = arith.addf %113, %115 : vector<2x16xf32>
    %117 = math.tanh %116 : vector<2x16xf32>
    %c7_i32 = arith.constant 7 : i32
    %118 = vector.broadcast %c7_i32 : i32 to vector<1x8x1xi32>
    %119 = arith.cmpi eq, %15, %118 : vector<1x8x1xi32>
    %120 = vector.shape_cast %117 : vector<2x16xf32> to vector<2x1x16xf32>
    %121 = vector.shape_cast %119 : vector<1x8x1xi1> to vector<1x8x1xi1>
    %122 = vector.broadcast %121 : vector<1x8x1xi1> to vector<2x8x16xi1>
    %123 = vector.shape_cast %120 : vector<2x1x16xf32> to vector<2x1x16xf32>
    %124 = vector.broadcast %123 : vector<2x1x16xf32> to vector<2x8x16xf32>
    %125 = arith.select %122, %124, %112 : vector<2x8x16xi1>, vector<2x8x16xf32>
    %126 = vector.shape_cast %125 : vector<2x8x16xf32> to vector<16x16xf32>
    %cst_33 = arith.constant dense<0.000000e+00> : vector<16x32xf32>
    %127 = tpu.matmul %126, %4, %cst_33 {dimension_numbers = #tpu.dot_dimension_numbers<[1], [0], [0], [1], [0, 0, 1, 1], [], []>} : vector<16x16xf32>, vector<16x32xf32>, vector<16x32xf32> -> vector<16x32xf32>
    %128 = vector.shape_cast %127 : vector<16x32xf32> to vector<2x8x32xf32>
    %c0_34 = arith.constant 0 : index
    %129 = arith.index_cast %18 : i32 to index
    %c0_35 = arith.constant 0 : index
    %130 = vector.load %arg10[%c0_34, %129, %c0_35] : memref<2x8x32xf32, #tpu.memory_space<vmem>>, vector<2x8x32xf32>
    %131 = arith.addf %128, %130 : vector<2x8x32xf32>
    %c0_36 = arith.constant 0 : index
    %132 = arith.index_cast %18 : i32 to index
    %c0_37 = arith.constant 0 : index
    %133 = vector.load %arg7[%c0_36, %132, %c0_37] : memref<2x8x32xf32, #tpu.memory_space<vmem>>, vector<2x8x32xf32>
    tpu.vector_store %arg7[%c0_36, %132, %c0_37], %131 {strides = array<i32>} : memref<2x8x32xf32, #tpu.memory_space<vmem>>, vector<2x8x32xf32>,
    %c1_i32_38 = arith.constant 1 : i32
    %c0_39 = arith.constant 0 : index
    %c0_40 = arith.constant 0 : index
    %134 = vector.load %arg8[%c0_39, %c0_40] : memref<2x16xf32, #tpu.memory_space<vmem>>, vector<2x16xf32>
    tpu.vector_store %arg8[%c0_39, %c0_40], %117 {strides = array<i32>} : memref<2x16xf32, #tpu.memory_space<vmem>>, vector<2x16xf32>,
    return
  }
  func.func @transform_0(%arg0: i32, %arg1: i32) -> (i32, i32, i32) {
    %c0_i32 = arith.constant 0 : i32
    %c0_i32_0 = arith.constant 0 : i32
    return %arg0, %arg1, %c0_i32 : i32, i32, i32
  }
  func.func @transform_1(%arg0: i32, %arg1: i32) -> (i32, i32) {
    %c0_i32 = arith.constant 0 : i32
    %c0_i32_0 = arith.constant 0 : i32
    %c0_i32_1 = arith.constant 0 : i32
    return %c0_i32, %c0_i32_0 : i32, i32
  }
  func.func @transform_2(%arg0: i32, %arg1: i32) -> (i32, i32) {
    %c0_i32 = arith.constant 0 : i32
    %c0_i32_0 = arith.constant 0 : i32
    %c0_i32_1 = arith.constant 0 : i32
    return %c0_i32, %c0_i32_0 : i32, i32
  }
  func.func @transform_3(%arg0: i32, %arg1: i32) -> (i32, i32) {
    %c0_i32 = arith.constant 0 : i32
    %c0_i32_0 = arith.constant 0 : i32
    %c0_i32_1 = arith.constant 0 : i32
    return %c0_i32, %c0_i32_0 : i32, i32
  }
  func.func @transform_4(%arg0: i32, %arg1: i32) -> (i32, i32) {
    %c0_i32 = arith.constant 0 : i32
    %c0_i32_0 = arith.constant 0 : i32
    %c0_i32_1 = arith.constant 0 : i32
    return %c0_i32, %c0_i32_0 : i32, i32
  }
  func.func @transform_5(%arg0: i32, %arg1: i32) -> (i32, i32, i32) {
    %c0_i32 = arith.constant 0 : i32
    %c0_i32_0 = arith.constant 0 : i32
    return %arg0, %arg1, %c0_i32 : i32, i32, i32
  }
}

</mosaic_0001>

<bundles_post_ra>
// kernel: tpu_custom_call.1
= control target key start
LH: loop header
LB: loop body
LE: loop exit
PB: predicated region body
PF: predicated region fallthrough
CT: control target
= control target key end

     0   :  { %10 = vsyncpa [#allocation6], 0  ;;  %s1795_s0 = inlined_call_operand.vmem [shape: f32[2,8,32], index: 0, kind: input, shape index: {}]   ;;  %s1796_s1 = inlined_call_operand.hbm [shape: f32[16,16], index: 1, kind: input, shape index: {}]   ;;  %s1797_s2 = inlined_call_operand.vmem [shape: f32[32,16], index: 2, kind: input, shape index: {}]   ;;  %s1798_s3 = inlined_call_operand.hbm [shape: f32[16,32], index: 3, kind: input, shape index: {}]   ;;  %s1799_s4 = inlined_call_operand.vmem [shape: f32[32,32], index: 4, kind: input, shape index: {}]   ;;  %s1800_s5 = inlined_call_operand.hbm [shape: f32[2,8,32], index: 5, kind: output, shape index: {}]  }
   0x1   :  { %11 = vsyncpa [#allocation9], 0 }
   0x2   :  { %12 = vsyncpa [#allocation7], 0  ;;  %s1545_s18 = smov [#allocation5]   ;;  %s1473_s22 = scalar_lea.hbm %s1796_s1, 256 }
   0x3   :  { %s20_s19 = sshll.u32 %s1545_s18, 4  ;;  %p1474_p0 = scmp.ne.s32.totalorder %s1796_s1, %s1473_s22  ;;  %s21_s19 = int_to_ptr.vmem [resolvable:$true] %s20_s19 }
   0x4   :  { %p1477_p1 = scmp.lt.u32.totalorder %s1473_s22, %s1796_s1 }
   0x6   :  { %p1479_p2 = pnand %p1477_p1, %p1474_p0 }
   0x8   :  { %1482 = shalt.err (!%p1479_p2)
}
   0x9   :  { %s1483_s27 = scalar_lea.vmem %s21_s19, 256  ;;  %p1488_p4 = scmp.lt.s32.totalorder %s21_s19, %s21_s19 }
   0xa   :  { %p1484_p3 = scmp.ne.s32.totalorder %s21_s19, %s1483_s27  ;;  %p1489_p5 = scmp.lt.s32.totalorder %s1483_s27, %s1483_s27 }
   0xc   :  { %p1490_p6 = por %p1489_p5, %p1488_p4 }
   0xe   :  { %p1491_p7 = pnand %p1490_p6, %p1484_p3 }
  0x10   :  { %1494 = shalt.err (!%p1491_p7)
}
  0x11   :  { %s1546_s28 = smov 128   ;;  %s1547_s29 = smov 8  }
  0x12   :  { %26 = dma.hbm_to_vmem [thread:$0]  %s1796_s1, 256, %s21_s19, [#allocation6], %s1546_s28, %s1546_s28, %s1547_s29  }
  0x13   :  { %s1548_s7 = smov [#allocation8]   ;;  %s1495_s11 = scalar_lea.hbm %s1798_s3, 256 }
  0x14   :  { %s34_s8 = sshll.u32 %s1548_s7, 4  ;;  %p1496_p8 = scmp.ne.s32.totalorder %s1798_s3, %s1495_s11  ;;  %s35_s8 = int_to_ptr.vmem [resolvable:$true] %s34_s8 }
  0x15   :  { %p1499_p9 = scmp.lt.u32.totalorder %s1495_s11, %s1798_s3 }
  0x17   :  { %p1501_p10 = pnand %p1499_p9, %p1496_p8 }
  0x19   :  { %1504 = shalt.err (!%p1501_p10)
}
  0x1a   :  { %s1505_s16 = scalar_lea.vmem %s35_s8, 256  ;;  %p1510_p12 = scmp.lt.s32.totalorder %s35_s8, %s35_s8 }
  0x1b   :  { %p1506_p11 = scmp.ne.s32.totalorder %s35_s8, %s1505_s16  ;;  %p1511_p13 = scmp.lt.s32.totalorder %s1505_s16, %s1505_s16 }
  0x1d   :  { %p1512_p0 = por %p1511_p13, %p1510_p12 }
  0x1f   :  { %p1513_p1 = pnand %p1512_p0, %p1506_p11 }
  0x21   :  { %1516 = shalt.err (!%p1513_p1)
}
  0x22   :  { %40 = dma.hbm_to_vmem [thread:$0]  %s1798_s3, 256, %s35_s8, [#allocation9], %s1546_s28, %s1546_s28, %s1547_s29  }
  0x23   :  { %1539 = dma.done.wait [#allocation6], 256  }
  0x24   :  { %1540 = vsyncadd [#allocation6], 4294967040 }
  0x25   :  { %1541 = dma.done.wait [#allocation9], 256  }
  0x26   :  { %1542 = vsyncadd [#allocation9], 4294967040  ;;  %vm53_vm0 = vcmask 123904   ;;  %v1549_v0 = vmov 0.0   ;;  %vm65_vm1 = vcmask 261120   ;;  %v61_v1 = vld [vmem:[%s1797_s2] sm:$0xff]  ;;  %v231_v52 = vlaneseq }
  0x27   :  { %54 = vst.msk [vmem:[#allocation2] sm:$0x3] %vm53_vm0, %v1549_v0  ;;  %v62_v2 = vld [vmem:[%s1797_s2 + $0x8] sm:$0xff]  ;;  %v63_v3 = vld [vmem:[%s1797_s2 + $0x10] sm:$0xff]  ;;  %v64_v5 = vld [vmem:[%s1797_s2 + $0x18] sm:$0xff]  ;;  %v1550_v12 = vmov 0.0|0.0  }
  0x28   :  { %v1404_v4 = vpack.c.bf16 %v62_v2, %v61_v1  ;;  %v59_v6 = vld [vmem:[%s1795_s0] sm:$0xff]  ;;  %v1408_v7 = vpack.c.bf16 %v64_v5, %v63_v3  ;;  %v56_v9 = vld [vmem:[#allocation5 + $0x8] sm:$0xff]  ;;  %vm1551_vm2 = vmmov 0   ;;  %vm147_vm3 = vcmask 130048   ;;  %v153_v18 = vld [vmem:[%s1799_s4 + $0x18] sm:$0xff] }
  0x29   :  { %1327 = vmatprep.mubr.msk.f32.mxu0 %vm65_vm1, %v59_v6  ;;  %1338 = vmatprep.mubr.msk.f32.mxu1 %vm65_vm1, %v59_v6  ;;  %v55_v8 = vld [vmem:[#allocation5] sm:$0xff]  ;;  %v152_v17 = vld [vmem:[%s1799_s4 + $0x10] sm:$0xff]  ;;  %vm239_vm4 = vcmask 1041409   ;;  %v1552_v53 = vmov 1966171168   ;;  %v1694_v55 = vshrl.u32 %v231_v52, 7 }
  0x2a   :  { %1405 = vmatprep.subr.bf16.mxu0 %v1404_v4  ;;  %v60_v10 = vld [vmem:[%s1795_s0 + $0x8] sm:$0xff]  ;;  %v1636_v11 = vpack.c.bf16 %v56_v9, %v55_v8  ;;  %v150_v14 = vld [vmem:[%s1799_s4] sm:$0xff]  ;;  %v1416_v19 = vpack.c.bf16 %v153_v18, %v152_v17  ;;  %v319_v54 = vunpack.c.l.s4 %v1552_v53 }
  0x2b   :  { %1407 = vmatpush3.bf16.msra.mxu0 %v1404_v4  ;;  %v151_v15 = vld [vmem:[%s1799_s4 + $0x8] sm:$0xff]  ;;  %v1702_v1 = vsub.s32 0, %v1694_v55  ;;  %vm316_vm5 = vcmp.eq.s32.totalorder %v1694_v55, 0  ;;  %vm430_vm6 = vcmp.eq.s32.totalorder %v1694_v55, 1  ;;  %vm545_vm7 = vcmp.eq.s32.totalorder %v1694_v55, 2  ;;  %s1553_s4 = smov [#allocation10]  }
  0x2c   :  { %1409 = vmatprep.subr.bf16.mxu0 %v1408_v7  ;;  %v1412_v16 = vpack.c.bf16 %v151_v15, %v150_v14  ;;  %v320_v56 = vunpack.c.0.s8 %v319_v54  ;;  %vm660_vm8 = vcmp.eq.s32.totalorder %v1694_v55, 3  ;;  %vm775_vm9 = vcmp.eq.s32.totalorder %v1694_v55, 4  ;;  %s1252_s12 = sshll.u32 %s1553_s4, 4  ;;  %s1253_s12 = int_to_ptr.vmem [resolvable:$true] %s1252_s12 }
  0x2d   :  { %vm890_vm10 = vcmp.eq.s32.totalorder %v1694_v55, 5  ;;  %vm1005_vm11 = vcmp.eq.s32.totalorder %v1694_v55, 6  ;;  %vm1120_vm12 = vcmp.eq.s32.totalorder %v1694_v55, 7  ;;  %s1517_s13 = scalar_lea.vmem %s1253_s12, 256  ;;  %p1522_p3 = scmp.lt.s32.totalorder %s1253_s12, %s1253_s12 }
  0x2e   :  { %v233_v13 = vld [vmem:[#allocation2] sm:$0x3]  ;;  %1413 = vmatprep.subr.bf16.mxu1 %v1412_v16  ;;  %v1697_v58 = vsub.s32 %v320_v56, %v1694_v55  ;;  %p1518_p2 = scmp.ne.s32.totalorder %s1253_s12, %s1517_s13  ;;  %p1523_p4 = scmp.lt.s32.totalorder %s1517_s13, %s1517_s13 }
  0x2f   :  { %1411 = vmatpush3.bf16.msra.mxu0 %v1408_v7  ;;  %1415 = vmatpush3.bf16.msra.mxu1 %v1412_v16 }
  0x30   :  { %1420 = vmatprep.subr.bf16.mxu0 %v1550_v12  ;;  %1417 = vmatprep.subr.bf16.mxu1 %v1416_v19  ;;  %p1524_p5 = por %p1523_p4, %p1522_p3 }
  0x32   :  { %1328 = vmatmul.mubr.msk.f32.vlgmr.msra.gmra.mrb[0].mxu0 %vm65_vm1, %v60_v10  ;;  %p1525_p6 = pnand %p1524_p5, %p1518_p2 }
  0x33   :  { %1422 = vmatpush3.bf16.msra.mxu0 %v1636_v11  ;;  %1345 = vmatprep.mubr.msk.f32.mxu0 %vm1551_vm2, %v1549_v0 }
  0x34   :  { %1426 = vmatprep.subr.bf16.mxu0 %v1550_v12  ;;  %1419 = vmatpush3.bf16.msra.mxu1 %v1416_v19 }
  0x35   :  { %1423 = vmatprep.subr.bf16.mxu1 %v1550_v12 }
  0x36   :  { %1346 = vmatmul.mubr.msk.f32.vlgmr.msra.gmra.mrb[2].mxu0 %vm147_vm3, %v233_v13 }
  0x37   :  { %1428 = vmatpush3.bf16.msra.mxu0 %v1636_v11  ;;  %1359 = vmatprep.mubr.msk.f32.mxu0 %vm1551_vm2, %v1549_v0 }
  0x38   :  { %1432 = vmatprep.subr.bf16.mxu0 %v1550_v12  ;;  %1339 = vmatmul.mubr.msk.f32.vlgmr.msra.gmra.mrb[0].mxu1 %vm65_vm1, %v60_v10 }
  0x39   :  { %1425 = vmatpush3.bf16.msra.mxu1 %v1636_v11  ;;  %1352 = vmatprep.mubr.msk.f32.mxu1 %vm1551_vm2, %v1549_v0 }
  0x3a   :  { %1429 = vmatprep.subr.bf16.mxu1 %v1550_v12 }
 0x105   :  { %v1329_v20 = vpop.f32.mrb[0].mxu0 }
 0x106   :  { %149 = vst.msk [vmem:[#allocation3 + $0x8] sm:$0xff] %vm147_vm3, %v1329_v20  ;;  %v138_v21 = vpop.f32.mrb[1].mxu0 }
 0x107   :  { %148 = vst.msk [vmem:[#allocation3] sm:$0xff] %vm147_vm3, %v138_v21 }
 0x109   :  { %v311_v22 = vpop.f32.mrb[2].mxu0 }
 0x10a   :  { %v1347_v23 = vpop.f32.mrb[3].mxu0 }
 0x10b   :  { %v1340_v50 = vpop.f32.mrb[0].mxu1 }
 0x10c   :  { %230 = vst.msk [vmem:[#allocation4 + $0x8] sm:$0xff] %vm65_vm1, %v1340_v50  ;;  %v220_v51 = vpop.f32.mrb[1].mxu1 }
 0x10d   :  { %v235_v24 = vld [vmem:[#allocation3 + $0x8] sm:$0xff]  ;;  %229 = vst.msk [vmem:[#allocation4] sm:$0xff] %vm65_vm1, %v220_v51 }
 0x10e   :  { %v234_v25 = vld [vmem:[#allocation3] sm:$0xff]  ;;  %v238_v26 = vrot.slane %v235_v24, 7  ;;  %v469_v27 = vrot.slane %v235_v24, 1  ;;  %v584_v28 = vrot.slane %v235_v24, 2  ;;  %v699_v29 = vrot.slane %v235_v24, 3 }
 0x10f   :  { %v354_v30 = vrot.slane %v234_v25, 1  ;;  %v468_v31 = vrot.slane %v234_v25, 2  ;;  %v583_v32 = vrot.slane %v234_v25, 3  ;;  %v698_v33 = vrot.slane %v234_v25, 4 }
 0x110   :  { %v240_v34 = vsel %vm239_vm4, %v238_v26, %v234_v25  ;;  %v813_v35 = vrot.slane %v234_v25, 5  ;;  %v814_v36 = vrot.slane %v235_v24, 4  ;;  %v928_v37 = vrot.slane %v234_v25, 6 }
 0x111   :  { %v312_v38 = vadd.f32 %v311_v22, %v240_v34  ;;  %v355_v39 = vsel %vm239_vm4, %v235_v24, %v354_v30  ;;  %v470_v40 = vsel %vm239_vm4, %v469_v27, %v468_v31  ;;  %v1673_v41 = vsel %vm239_vm4, %v584_v28, %v583_v32 }
 0x112   :  { %v1676_v42 = vsel %vm239_vm4, %v699_v29, %v698_v33  ;;  %v1679_v43 = vsel %vm239_vm4, %v814_v36, %v813_v35  ;;  %v929_v44 = vrot.slane %v235_v24, 5  ;;  %v1043_v45 = vrot.slane %v234_v25, 7 }
 0x113   :  { %1457 = vtanh.f32 %v312_v38  ;;  %v1044_v46 = vrot.slane %v235_v24, 6 }
 0x114   :  { %v1682_v47 = vsel %vm239_vm4, %v929_v44, %v928_v37 }
 0x115   :  { %v1685_v48 = vsel %vm239_vm4, %v1044_v46, %v1043_v45 }
 0x11d   :  { %v1458_v49 = vpop.eup %1457 }
 0x11e   :  { %1353 = vmatmul.mubr.msk.f32.vlgmr.msra.gmra.mrb[2].mxu1 %vm147_vm3, %v1458_v49  ;;  %v324_v61 = vrot.slane %v1458_v49, %v1697_v58 }
 0x11f   :  { %1431 = vmatpush3.bf16.msra.mxu1 %v1636_v11  ;;  %1366 = vmatprep.mubr.msk.f32.mxu1 %vm1551_vm2, %v1549_v0 }
 0x120   :  { %1435 = vmatprep.subr.bf16.mxu1 %v1550_v12  ;;  %v325_v62 = vcombine.high %v324_v61, %v324_v61  ;;  %v332_v63 = vrot.slane %v324_v61, %v1697_v58 }
 0x122   :  { %v339_v3 = vrot.slane %v325_v62, %v1697_v58  ;;  %v345_v5 = vrot.slane %v332_v63, %v1702_v1 }
 0x124   :  { %v349_v8 = vrot.slane %v339_v3, %v1702_v1  ;;  %v352_v13 = vsel %vm316_vm5, %v345_v5, 0.0 }
 0x126   :  { %v353_v16 = vsel %vm316_vm5, %v349_v8, 0.0 }
 0x1f1   :  { %v425_v57 = vpop.f32.mrb[2].mxu1 }
 0x1f2   :  { %v426_v59 = vadd.f32 %v425_v57, %v355_v39  ;;  %v1354_v60 = vpop.f32.mrb[3].mxu1 }
 0x1f4   :  { %1459 = vtanh.f32 %v426_v59 }
 0x1fe   :  { %v1460_v2 = vpop.eup %1459 }
 0x1ff   :  { %v438_v4 = vrot.slane %v1460_v2, %v1697_v58  ;;  %1360 = vmatmul.mubr.msk.f32.vlgmr.msra.gmra.mrb[4].mxu0 %vm147_vm3, %v1460_v2 }
 0x200   :  { %1434 = vmatpush3.bf16.msra.mxu0 %v1636_v11  ;;  %1373 = vmatprep.mubr.msk.f32.mxu0 %vm1551_vm2, %v1549_v0 }
 0x201   :  { %v439_v6 = vcombine.high %v438_v4, %v438_v4  ;;  %v446_v7 = vrot.slane %v438_v4, %v1697_v58  ;;  %1438 = vmatprep.subr.bf16.mxu0 %v1550_v12 }
 0x203   :  { %v453_v9 = vrot.slane %v439_v6, %v1697_v58  ;;  %v459_v10 = vrot.slane %v446_v7, %v1702_v1 }
 0x205   :  { %v463_v14 = vrot.slane %v453_v9, %v1702_v1  ;;  %v466_v15 = vsel %vm430_vm6, %v459_v10, %v352_v13 }
 0x207   :  { %v467_v17 = vsel %vm430_vm6, %v463_v14, %v353_v16 }
 0x2d2   :  { %v540_v18 = vpop.f32.mrb[4].mxu0 }
 0x2d3   :  { %v541_v19 = vadd.f32 %v540_v18, %v470_v40  ;;  %v1361_v20 = vpop.f32.mrb[5].mxu0  ;;  %v57_v18 = vld [vmem:[#allocation8] sm:$0xff] }
 0x2d5   :  { %1461 = vtanh.f32 %v541_v19  ;;  %v58_v19 = vld [vmem:[#allocation8 + $0x8] sm:$0xff] }
 0x2d6   :  { %v1444_v20 = vpack.c.bf16 %v58_v19, %v57_v18 }
 0x2df   :  { %v1462_v21 = vpop.eup %1461 }
 0x2e0   :  { %v553_v22 = vrot.slane %v1462_v21, %v1697_v58  ;;  %1367 = vmatmul.mubr.msk.f32.vlgmr.msra.gmra.mrb[4].mxu1 %vm147_vm3, %v1462_v21 }
 0x2e1   :  { %1437 = vmatpush3.bf16.msra.mxu1 %v1636_v11  ;;  %1380 = vmatprep.mubr.msk.f32.mxu1 %vm1551_vm2, %v1549_v0 }
 0x2e2   :  { %v554_v23 = vcombine.high %v553_v22, %v553_v22  ;;  %v561_v24 = vrot.slane %v553_v22, %v1697_v58  ;;  %1441 = vmatprep.subr.bf16.mxu1 %v1550_v12 }
 0x2e4   :  { %v568_v25 = vrot.slane %v554_v23, %v1697_v58  ;;  %v574_v26 = vrot.slane %v561_v24, %v1702_v1 }
 0x2e6   :  { %v578_v27 = vrot.slane %v568_v25, %v1702_v1  ;;  %v581_v28 = vsel %vm545_vm7, %v574_v26, %v466_v15 }
 0x2e8   :  { %v582_v29 = vsel %vm545_vm7, %v578_v27, %v467_v17 }
 0x3b3   :  { %v655_v30 = vpop.f32.mrb[4].mxu1 }
 0x3b4   :  { %v656_v31 = vadd.f32 %v655_v30, %v1673_v41  ;;  %v1368_v32 = vpop.f32.mrb[5].mxu1 }
 0x3b6   :  { %1463 = vtanh.f32 %v656_v31 }
 0x3c0   :  { %v1464_v33 = vpop.eup %1463 }
 0x3c1   :  { %v668_v34 = vrot.slane %v1464_v33, %v1697_v58  ;;  %1374 = vmatmul.mubr.msk.f32.vlgmr.msra.gmra.mrb[6].mxu0 %vm147_vm3, %v1464_v33  ;;  %v1240_v33 = vld [vmem:[#allocation4 + $0x8] sm:$0xff] }
 0x3c2   :  { %1440 = vmatpush3.bf16.msra.mxu0 %v1636_v11  ;;  %1387 = vmatprep.mubr.msk.f32.mxu0 %vm1551_vm2, %v1549_v0 }
 0x3c3   :  { %v669_v12 = vcombine.high %v668_v34, %v668_v34  ;;  %v676_v35 = vrot.slane %v668_v34, %v1697_v58  ;;  %1445 = vmatprep.subr.bf16.mxu0 %v1444_v20 }
 0x3c5   :  { %v683_v36 = vrot.slane %v669_v12, %v1697_v58  ;;  %v689_v37 = vrot.slane %v676_v35, %v1702_v1  ;;  %v1239_v35 = vld [vmem:[#allocation4] sm:$0xff] }
 0x3c7   :  { %v693_v38 = vrot.slane %v683_v36, %v1702_v1  ;;  %v696_v39 = vsel %vm660_vm8, %v689_v37, %v581_v28 }
 0x3c9   :  { %v697_v40 = vsel %vm660_vm8, %v693_v38, %v582_v29 }
 0x494   :  { %v770_v41 = vpop.f32.mrb[6].mxu0 }
 0x495   :  { %v771_v44 = vadd.f32 %v770_v41, %v1676_v42  ;;  %v1375_v45 = vpop.f32.mrb[7].mxu0 }
 0x497   :  { %1465 = vtanh.f32 %v771_v44 }
 0x4a1   :  { %v1466_v46 = vpop.eup %1465 }
 0x4a2   :  { %v783_v49 = vrot.slane %v1466_v46, %v1697_v58  ;;  %1381 = vmatmul.mubr.msk.f32.vlgmr.msra.gmra.mrb[6].mxu1 %vm147_vm3, %v1466_v46 }
 0x4a3   :  { %1443 = vmatpush3.bf16.msra.mxu1 %v1636_v11  ;;  %1394 = vmatprep.mubr.msk.f32.mxu1 %vm1551_vm2, %v1549_v0 }
 0x4a4   :  { %v784_v50 = vcombine.high %v783_v49, %v783_v49  ;;  %v791_v51 = vrot.slane %v783_v49, %v1697_v58 }
 0x4a6   :  { %v798_v52 = vrot.slane %v784_v50, %v1697_v58  ;;  %v804_v42 = vrot.slane %v791_v51, %v1702_v1 }
 0x4a8   :  { %v811_v53 = vsel %vm775_vm9, %v804_v42, %v696_v39  ;;  %v808_v54 = vrot.slane %v798_v52, %v1702_v1 }
 0x4aa   :  { %v812_v56 = vsel %vm775_vm9, %v808_v54, %v697_v40 }
 0x575   :  { %v885_v57 = vpop.f32.mrb[6].mxu1 }
 0x576   :  { %v886_v59 = vadd.f32 %v885_v57, %v1679_v43  ;;  %v1382_v11 = vpop.f32.mrb[7].mxu1 }
 0x578   :  { %1467 = vtanh.f32 %v886_v59 }
 0x582   :  { %v1468_v60 = vpop.eup %1467 }
 0x583   :  { %v898_v0 = vrot.slane %v1468_v60, %v1697_v58  ;;  %1388 = vmatmul.mubr.msk.f32.vlgmr.msra.gmra.mrb[8].mxu0 %vm147_vm3, %v1468_v60 }
 0x584   :  { %1447 = vmatpush3.bf16.msra.mxu0 %v1444_v20 }
 0x585   :  { %v899_v61 = vcombine.high %v898_v0, %v898_v0  ;;  %v906_v62 = vrot.slane %v898_v0, %v1697_v58 }
 0x587   :  { %v913_v63 = vrot.slane %v899_v61, %v1697_v58  ;;  %v919_v2 = vrot.slane %v906_v62, %v1702_v1 }
 0x589   :  { %v926_v3 = vsel %vm890_vm10, %v919_v2, %v811_v53  ;;  %v923_v4 = vrot.slane %v913_v63, %v1702_v1 }
 0x58b   :  { %v927_v43 = vsel %vm890_vm10, %v923_v4, %v812_v56 }
 0x656   :  { %v1000_v5 = vpop.f32.mrb[8].mxu0 }
 0x657   :  { %v1001_v6 = vadd.f32 %v1000_v5, %v1682_v47  ;;  %v1389_v7 = vpop.f32.mrb[9].mxu0 }
 0x659   :  { %1469 = vtanh.f32 %v1001_v6 }
 0x663   :  { %v1470_v8 = vpop.eup %1469 }
 0x664   :  { %v1013_v9 = vrot.slane %v1470_v8, %v1697_v58  ;;  %1395 = vmatmul.mubr.msk.f32.vlgmr.msra.gmra.mrb[8].mxu1 %vm147_vm3, %v1470_v8 }
 0x666   :  { %v1014_v10 = vcombine.high %v1013_v9, %v1013_v9  ;;  %v1021_v13 = vrot.slane %v1013_v9, %v1697_v58 }
 0x668   :  { %v1034_v14 = vrot.slane %v1021_v13, %v1702_v1  ;;  %v1028_v15 = vrot.slane %v1014_v10, %v1697_v58 }
 0x66a   :  { %v1041_v16 = vsel %vm1005_vm11, %v1034_v14, %v926_v3  ;;  %v1038_v17 = vrot.slane %v1028_v15, %v1702_v1 }
 0x66c   :  { %v1042_v47 = vsel %vm1005_vm11, %v1038_v17, %v927_v43 }
 0x737   :  { %v1115_v21 = vpop.f32.mrb[8].mxu1 }
 0x738   :  { %v1116_v22 = vadd.f32 %v1115_v21, %v1685_v48  ;;  %v1396_v23 = vpop.f32.mrb[9].mxu1 }
 0x73a   :  { %1471 = vtanh.f32 %v1116_v22 }
 0x744   :  { %v1472_v24 = vpop.eup %1471 }
 0x745   :  { %1246 = vst.msk [vmem:[#allocation2] sm:$0x3] %vm53_vm0, %v1472_v24  ;;  %v1128_v25 = vrot.slane %v1472_v24, %v1697_v58 }
 0x747   :  { %v1129_v26 = vcombine.high %v1128_v25, %v1128_v25  ;;  %v1136_v27 = vrot.slane %v1128_v25, %v1697_v58 }
 0x749   :  { %v1149_v28 = vrot.slane %v1136_v27, %v1702_v1  ;;  %v1143_v29 = vrot.slane %v1129_v26, %v1697_v58 }
 0x74b   :  { %v1156_v30 = vsel %vm1120_vm12, %v1149_v28, %v1041_v16  ;;  %v1153_v31 = vrot.slane %v1143_v29, %v1702_v1 }
 0x74c   :  { %1401 = vmatprep.mubr.msk.f32.mxu0 %vm147_vm3, %v1156_v30 }
 0x74d   :  { %v1157_v48 = vsel %vm1120_vm12, %v1153_v31, %v1042_v47 }
 0x74e   :  { %1402 = vmatmul.mubr.msk.f32.vlgmr.msra.gmra.mrb[10].mxu0 %vm147_vm3, %v1157_v48 }
 0x821   :  { %v1403_v32 = vpop.f32.mrb[10].mxu0 }
 0x822   :  { %v1242_v34 = vadd.f32 %v1403_v32, %v1240_v33  ;;  %v1230_v12 = vpop.f32.mrb[11].mxu0 }
 0x823   :  { %v1241_v55 = vadd.f32 %v1239_v35, %v1230_v12 }
 0x824   :  { %1244 = vst.msk [vmem:[#allocation10 + $0x8] sm:$0xff] %vm65_vm1, %v1242_v34 }
 0x825   :  { %1243 = vst.msk [vmem:[#allocation10] sm:$0xff] %vm65_vm1, %v1241_v55 }
 0x826   :  { %1528 = shalt.err (!%p1525_p6)
}
 0x827   :  { %s1529_s16 = scalar_lea.hbm %s1800_s5, 256 }
 0x828   :  { %p1530_p7 = scmp.ne.s32.totalorder %s1800_s5, %s1529_s16  ;;  %p1533_p8 = scmp.lt.u32.totalorder %s1529_s16, %s1800_s5 }
 0x82a   :  { %p1535_p9 = pnand %p1533_p8, %p1530_p7 }
 0x82c   :  { %1538 = shalt.err (!%p1535_p9)
}
 0x82d   :  { %1258 = dma.vmem_to_hbm [thread:$0]  %s1253_s12, 256, %s1800_s5, [#allocation7], %s1546_s28, %s1546_s28, %s1547_s29  }
 0x82e   :  { %1543 = dma.done.wait [#allocation7], 256  }
 0x82f   :  { %1544 = vsyncadd [#allocation7], 4294967040 }
 0x830   :  { %1262 = vsyncpa [#allocation6], 1 }
 0x831   :  { %1263 = vsyncpa [#allocation9], 1 }
 0x832   :  { %1264 = vsyncpa [#allocation7], 1 }

</bundles_post_ra>
